<compile_context>
chip_gen: v6e
topology: v6e:2x2x1
jax: 0.10.0
libtpu: 0.0.40
codegen_flags: <defaults>
</compile_context>

<pallas_src>
import functools

import jax
import jax.numpy as jnp
from jax.experimental import pallas as pl
from jax.experimental.pallas import tpu as pltpu


def _round_up(a: int, b: int) -> int:
    return ((a + b - 1) // b) * b


def _trim_kernel(x_ref, o_ref):
    # Used when S is a multiple of 128: output block (P, S, S) is already
    # lane-dense, so this is a straight crop-copy.
    s = o_ref.shape[-1]
    o_ref[...] = x_ref[:, :s, :s]


def _trim_flat_kernel(s, x_ref, o_ref):
    # Lane-dense path: compact the (P, S, S) crop into a (P, S*S) slab so the
    # writeback DMA stores dense rows instead of masked S-wide partial rows.
    # The in-kernel relayout hides under DMA time (no VLIW slot is saturated).
    p = o_ref.shape[0]
    o_ref[...] = x_ref[:, :s, :s].reshape(p, s * s)


def _build_call(xr, *, nc, s, s_rows, w_cols, p, flatten, bytes_accessed):
    grid = (pl.cdiv(nc, p),)
    in_spec = pl.BlockSpec((p, s_rows, w_cols), lambda i: (i, 0, 0))

    if flatten:
        kernel = functools.partial(_trim_flat_kernel, s)
        out_shape = jax.ShapeDtypeStruct((nc, s * s), xr.dtype)
        out_spec = pl.BlockSpec((p, s * s), lambda i: (i, 0))
    else:
        kernel = _trim_kernel
        out_shape = jax.ShapeDtypeStruct((nc, s, s), xr.dtype)
        out_spec = pl.BlockSpec((p, s, s), lambda i: (i, 0, 0))

    return pl.pallas_call(
        kernel,
        out_shape=out_shape,
        grid_spec=pltpu.PrefetchScalarGridSpec(
            num_scalar_prefetch=0,
            grid=grid,
            in_specs=[in_spec],
            out_specs=out_spec,
        ),
        compiler_params=pltpu.CompilerParams(
            dimension_semantics=("parallel",),
            vmem_limit_bytes=32 * 1024 * 1024,  # safe on v5e/v6e/v7x
        ),
        cost_estimate=pl.CostEstimate(
            flops=0, transcendentals=0, bytes_accessed=bytes_accessed
        ),
    )(xr)


def trim(
    x: jax.Array,
    output_size: int,
    *,
    target_in_bytes: int = 4 << 20,     # ~4 MiB input tile (HBM-roofline regime)
    vmem_budget_bytes: int = 24 << 20,  # total double-buffered footprint budget
) -> jax.Array:
    """Pallas equivalent of Trim(output_size)(x) for NCHW input."""
    n, c, h, w = x.shape
    s = int(output_size)
    assert 0 < s <= h and s <= w, "output_size must not exceed spatial dims"

    nc = n * c
    xr = x.reshape(nc, h, w)  # fuse batch & channel planes (free, contiguous)

    itemsize = jnp.dtype(x.dtype).itemsize
    # Sublane packing granule: 8 for 32-bit, 16 for bf16/fp16, 32 for int8/fp8.
    sub = max(8, 32 // itemsize)

    # Rows: only what we need, rounded to the packing granule (or full H).
    s_rows = min(h, _round_up(s, sub))
    # Cols: only what we need, rounded to 128 lanes (or full W).
    w_cols = min(w, _round_up(s, 128))

    # Lane-dense flattened output unless S is already a multiple of 128.
    flatten = (s % 128) != 0

    # Planes per grid step, sized from *padded* VMEM footprints, x2 buffers.
    in_plane = _round_up(s_rows, sub) * _round_up(w_cols, 128) * itemsize
    if flatten:
        out_plane = _round_up(s * s, 128) * itemsize
    else:
        out_plane = _round_up(s, sub) * _round_up(s, 128) * itemsize
    p_vmem = max(1, vmem_budget_bytes // (2 * (in_plane + out_plane)))
    p = max(1, min(nc, target_in_bytes // in_plane, p_vmem))
    # Keep >=2 grid steps when possible so v7x's two TCs both get work; with
    # multi-MiB tiles the extra ~0.35us/step on single-TC chips is negligible.
    if nc >= 2:
        p = max(1, min(p, pl.cdiv(nc, 2)))
    if flatten:
        # (8,128) rule on the 2-D output block: p must be a multiple of the
        # sublane granule or equal the full leading dim.
        if p >= nc or nc <= sub:
            p = nc
        else:
            p = max(sub, (p // sub) * sub)

    # True HBM traffic after the column trim (for XLA's scheduler).
    bytes_accessed = nc * (s_rows * w_cols + s * s) * itemsize

    kwargs = dict(
        nc=nc, s=s, s_rows=s_rows, w_cols=w_cols, p=p,
        bytes_accessed=bytes_accessed,
    )
    try:
        out = jax.block_until_ready(_build_call(xr, flatten=flatten, **kwargs))
    except Exception:
        # Defensive (eager-mode) fallback: if the in-kernel compaction reshape
        # fails to lower on some shape/dtype, fall back to the always-legal
        # 3-D output path (same semantics, just non-lane-dense stores).
        if not flatten:
            raise
        out = jax.block_until_ready(_build_call(xr, flatten=False, **kwargs))

    return out.reshape(n, c, s, s)


if __name__ == "__main__":
    key = jax.random.PRNGKey(0)

    # Small NCHW input consistent with the module's forward.
    x = jax.random.normal(key, (2, 4, 16, 16), dtype=jnp.float32)
    output_size = 8

    out = jax.block_until_ready(trim(x, output_size))
    ref = x[:, :, :output_size, :output_size]
    assert out.shape == (2, 4, output_size, output_size)
    assert out.dtype == x.dtype
    assert jnp.array_equal(out, ref)

    # Secondary check: odd, non-aligned spatial sizes (exercises ragged rows /
    # lane-dense flatten path).
    x2 = jax.random.normal(jax.random.PRNGKey(0), (1, 3, 20, 24), dtype=jnp.float32)
    out2 = jax.block_until_ready(trim(x2, 9))
    assert jnp.array_equal(out2, x2[:, :, :9, :9])

    print("KERNEL_OK")
</pallas_src>

<mosaic_0001>
module attributes {stable_mosaic.version = 11 : i64} {
  func.func @_trim_flat_kernel(%arg0: i32, %arg1: memref<8x8x16xf32, #tpu.memory_space<vmem>>, %arg2: memref<8x64xf32, #tpu.memory_space<vmem>>) attributes {dimension_semantics = [#tpu.dimension_semantics<parallel>], iteration_bounds = array<i64: 1>, scalar_prefetch = 0 : i64, scratch_operands = 0 : i64, tpu.core_type = #tpu.core_type<tc>, window_params = [{transform_indices = @transform_0, window_bounds = array<i64: 8, 8, 16>}, {transform_indices = @transform_1, window_bounds = array<i64: 8, 64>}]} {
    %c0 = arith.constant 0 : index
    %c0_0 = arith.constant 0 : index
    %c0_1 = arith.constant 0 : index
    %0 = vector.load %arg1[%c0, %c0_0, %c0_1] : memref<8x8x16xf32, #tpu.memory_space<vmem>>, vector<8x8x8xf32>
    %1 = vector.shape_cast %0 : vector<8x8x8xf32> to vector<8x64xf32>
    %c0_2 = arith.constant 0 : index
    %c0_3 = arith.constant 0 : index
    %2 = vector.load %arg2[%c0_2, %c0_3] : memref<8x64xf32, #tpu.memory_space<vmem>>, vector<8x64xf32>
    tpu.vector_store %arg2[%c0_2, %c0_3], %1 {strides = array<i32>} : memref<8x64xf32, #tpu.memory_space<vmem>>, vector<8x64xf32>,
    return
  }
  func.func @transform_0(%arg0: i32) -> (i32, i32, i32) {
    %c0_i32 = arith.constant 0 : i32
    %c0_i32_0 = arith.constant 0 : i32
    %c0_i32_1 = arith.constant 0 : i32
    return %arg0, %c0_i32, %c0_i32_0 : i32, i32, i32
  }
  func.func @transform_1(%arg0: i32) -> (i32, i32) {
    %c0_i32 = arith.constant 0 : i32
    %c0_i32_0 = arith.constant 0 : i32
    return %arg0, %c0_i32 : i32, i32
  }
}

module attributes {stable_mosaic.version = 11 : i64} {
  func.func @_trim_kernel(%arg0: i32, %arg1: memref<8x8x16xf32, #tpu.memory_space<vmem>>, %arg2: memref<8x8x8xf32, #tpu.memory_space<vmem>>) attributes {dimension_semantics = [#tpu.dimension_semantics<parallel>], iteration_bounds = array<i64: 1>, scalar_prefetch = 0 : i64, scratch_operands = 0 : i64, tpu.core_type = #tpu.core_type<tc>, window_params = [{transform_indices = @transform_0, window_bounds = array<i64: 8, 8, 16>}, {transform_indices = @transform_1, window_bounds = array<i64: 8, 8, 8>}]} {
    %c0 = arith.constant 0 : index
    %c0_0 = arith.constant 0 : index
    %c0_1 = arith.constant 0 : index
    %0 = vector.load %arg1[%c0, %c0_0, %c0_1] : memref<8x8x16xf32, #tpu.memory_space<vmem>>, vector<8x8x8xf32>
    %c0_2 = arith.constant 0 : index
    %c0_3 = arith.constant 0 : index
    %c0_4 = arith.constant 0 : index
    %1 = vector.load %arg2[%c0_2, %c0_3, %c0_4] : memref<8x8x8xf32, #tpu.memory_space<vmem>>, vector<8x8x8xf32>
    tpu.vector_store %arg2[%c0_2, %c0_3, %c0_4], %0 {strides = array<i32>} : memref<8x8x8xf32, #tpu.memory_space<vmem>>, vector<8x8x8xf32>,
    return
  }
  func.func @transform_0(%arg0: i32) -> (i32, i32, i32) {
    %c0_i32 = arith.constant 0 : i32
    %c0_i32_0 = arith.constant 0 : i32
    %c0_i32_1 = arith.constant 0 : i32
    return %arg0, %c0_i32, %c0_i32_0 : i32, i32, i32
  }
  func.func @transform_1(%arg0: i32) -> (i32, i32, i32) {
    %c0_i32 = arith.constant 0 : i32
    %c0_i32_0 = arith.constant 0 : i32
    %c0_i32_1 = arith.constant 0 : i32
    return %arg0, %c0_i32, %c0_i32_0 : i32, i32, i32
  }
}

</mosaic_0001>

<bundles_post_ra>
// kernel: tpu_custom_call.1
= control target key start
LH: loop header
LB: loop body
LE: loop exit
PB: predicated region body
PF: predicated region fallthrough
CT: control target
= control target key end

     0   :  { %6 = vsyncpa [#allocation3], 0  ;;  %s326_s0 = inlined_call_operand.hbm [shape: f32[8,16,16], index: 0, kind: input, shape index: {}]   ;;  %s327_s1 = inlined_call_operand.hbm [shape: f32[8,64], index: 1, kind: output, shape index: {}]  }
   0x1   :  { %7 = vsyncpa [#allocation4], 0  ;;  %s295_s6 = smov [#allocation2]  }
   0x2   :  { %s13_s7 = sshll.u32 %s295_s6, 4  ;;  %s14_s7 = int_to_ptr.vmem [resolvable:$true] %s13_s7 }
   0x3   :  { %s259_s8 = scalar_lea.vmem %s14_s7, 1024  ;;  %p264_p1 = scmp.lt.s32.totalorder %s14_s7, %s14_s7 }
   0x4   :  { %p260_p0 = scmp.ne.s32.totalorder %s14_s7, %s259_s8  ;;  %p265_p2 = scmp.lt.s32.totalorder %s259_s8, %s259_s8 }
   0x6   :  { %p266_p3 = por %p265_p2, %p264_p1 }
   0x8   :  { %p267_p4 = pnand %p266_p3, %p260_p0 }
   0xa   :  { %270 = shalt.err (!%p267_p4)
}
   0xb   :  { %s296_s9 = smov 256   ;;  %s297_s10 = smov 128  }
   0xc   :  { %s298_s11 = smov 8  }
   0xd   :  { %19 = dma.hbm_to_vmem [thread:$0]  %s326_s0, 1024, %s14_s7, [#allocation3], %s296_s9, %s297_s10, %s298_s11  }
   0xe   :  { %291 = dma.done.wait [#allocation3], 1024  }
   0xf   :  { %292 = vsyncadd [#allocation3], 4294966272  ;;  %v36_v0 = vlaneseq  ;;  %v299_v1 = vmov 1983009808   ;;  %v300_v5 = vmov 1934713408  }
  0x10   :  { %v34_v2 = vunpack.c.l.s4 %v299_v1  ;;  %v98_v6 = vunpack.c.l.s4 %v300_v5  ;;  %v239_v9 = vld [vmem:[#allocation2] ss:$16 sps:$4 sm:$0xff]   ;;  %v241_v10 = vld [vmem:[#allocation2 + $0x4] ss:$16 sps:$4 sm:$0xff]   ;;  %v242_v11 = vld [vmem:[#allocation2 + $0x8] ss:$16 sps:$4 sm:$0xff]  }
  0x11   :  { %v37_v4 = vshrl.u32 %v36_v0, 7  ;;  %v244_v12 = vld [vmem:[#allocation2 + $0xc] ss:$16 sps:$4 sm:$0xff]   ;;  %v245_v14 = vld [vmem:[#allocation2 + $0x20] ss:$16 sps:$4 sm:$0xff]   ;;  %s301_s0 = smov 24  }
  0x12   :  { %v35_v3 = vunpack.c.0.s8 %v34_v2  ;;  %v99_v8 = vunpack.c.0.s8 %v98_v6  ;;  %v247_v15 = vld [vmem:[#allocation2 + $0x24] ss:$16 sps:$4 sm:$0xff]   ;;  %v248_v16 = vld [vmem:[#allocation2 + $0x28] ss:$16 sps:$4 sm:$0xff]   ;;  %v250_v18 = vld [vmem:[#allocation2 + $0x2c] ss:$16 sps:$4 sm:$0xff]  }
  0x13   :  { %s302_s14 = smov 16   ;;  %s303_s15 = smov 32   ;;  %vm195_vm0 = vcmask 64512   ;;  %vm197_vm1 = vcmask 130048   ;;  %vm199_vm2 = vcmask 195584   ;;  %vm201_vm3 = vcmask 261120  }
  0x14   :  { %v38_v7 = vsub.s32 %v35_v3, %v37_v4  ;;  %v102_v19 = vsub.s32 %v99_v8, %v37_v4  ;;  %s304_s16 = smov 40   ;;  %s305_s17 = smov 48   ;;  %vm203_vm4 = vcmask 326656   ;;  %vm205_vm5 = vcmask 392192  }
  0x15   :  { %s306_s18 = smov 56   ;;  %s307_s19 = smov [#allocation5]   ;;  %vm207_vm6 = vcmask 457728   ;;  %vm209_vm7 = vcmask 523264  }
  0x16   :  { %v39_v13 = vrot.slane %v239_v9, %v38_v7  ;;  %v55_v17 = vrot.slane %v242_v11, %v38_v7  ;;  %v46_v20 = vrot.slane %v241_v10, %v38_v7  ;;  %v62_v21 = vrot.slane %v244_v12, %v38_v7  ;;  %s217_s20 = sshll.u32 %s307_s19, 4  ;;  %s218_s20 = int_to_ptr.vmem [resolvable:$true] %s217_s20 }
  0x17   :  { %v71_v22 = vrot.slane %v245_v14, %v38_v7  ;;  %v87_v23 = vrot.slane %v248_v16, %v38_v7  ;;  %v78_v24 = vrot.slane %v247_v15, %v38_v7  ;;  %v94_v27 = vrot.slane %v250_v18, %v38_v7  ;;  %s271_s21 = scalar_lea.vmem %s218_s20, 128  ;;  %p276_p6 = scmp.lt.s32.totalorder %s218_s20, %s218_s20 }
  0x18   :  { %v95_v25 = vcombine.low %v39_v13, %v55_v17  ;;  %v96_v26 = vcombine.high %v39_v13, %v55_v17  ;;  %v111_v28 = vcombine.low %v46_v20, %v62_v21  ;;  %v112_v34 = vcombine.high %v46_v20, %v62_v21  ;;  %p272_p5 = scmp.ne.s32.totalorder %s218_s20, %s271_s21  ;;  %p277_p7 = scmp.lt.s32.totalorder %s271_s21, %s271_s21 }
  0x19   :  { %v127_v29 = vcombine.low %v71_v22, %v87_v23  ;;  %v128_v30 = vcombine.high %v71_v22, %v87_v23  ;;  %v143_v33 = vcombine.low %v78_v24, %v94_v27  ;;  %v144_v38 = vcombine.high %v78_v24, %v94_v27 }
  0x1a   :  { %v103_v31 = vrot.slane %v95_v25, %v102_v19  ;;  %v110_v32 = vrot.slane %v96_v26, %v102_v19  ;;  %v119_v37 = vrot.slane %v111_v28, %v102_v19  ;;  %v126_v43 = vrot.slane %v112_v34, %v102_v19  ;;  %p278_p8 = por %p277_p7, %p276_p6 }
  0x1b   :  { %v135_v35 = vrot.slane %v127_v29, %v102_v19  ;;  %v142_v36 = vrot.slane %v128_v30, %v102_v19  ;;  %v151_v39 = vrot.slane %v143_v33, %v102_v19  ;;  %v158_v46 = vrot.slane %v144_v38, %v102_v19 }
  0x1c   :  { %p279_p9 = pnand %p278_p8, %p272_p5 }
  0x1d   :  { %v160_v40 = vcombine.high %v103_v31, %v135_v35  ;;  %v159_v41 = vcombine.low %v103_v31, %v135_v35  ;;  %v162_v42 = vcombine.high %v110_v32, %v142_v36  ;;  %v161_v44 = vcombine.low %v110_v32, %v142_v36 }
  0x1e   :  { %v163_v45 = vcombine.low %v119_v37, %v151_v39  ;;  %v164_v47 = vcombine.high %v119_v37, %v151_v39  ;;  %v165_v48 = vcombine.low %v126_v43, %v158_v46  ;;  %v166_v49 = vcombine.high %v126_v43, %v158_v46 }
  0x1f   :  { %168 = vrot.lane.b32.xlu0 %v160_v40, %s298_s11  ;;  %176 = vrot.lane.b32.xlu1 %v162_v42, %s301_s0 }
  0x23   :  { %172 = vrot.lane.b32.xlu0 %v161_v44, %s302_s14  ;;  %180 = vrot.lane.b32.xlu1 %v163_v45, %s303_s15 }
  0x27   :  { %184 = vrot.lane.b32.xlu0 %v164_v47, %s304_s16  ;;  %188 = vrot.lane.b32.xlu1 %v165_v48, %s305_s17 }
  0x2b   :  { %192 = vrot.lane.b32.xlu0 %v166_v49, %s306_s18 }
  0x91   :  { %v169_v50 = vpop.permute.xlu0 %168  ;;  %v177_v51 = vpop.permute.xlu1 %176 }
  0x92   :  { %v196_v52 = vsel %vm195_vm0, %v159_v41, %v169_v50 }
  0x95   :  { %v173_v53 = vpop.permute.xlu0 %172  ;;  %v181_v54 = vpop.permute.xlu1 %180 }
  0x96   :  { %v198_v55 = vsel %vm197_vm1, %v196_v52, %v173_v53 }
  0x97   :  { %v200_v56 = vsel %vm199_vm2, %v198_v55, %v177_v51 }
  0x98   :  { %v202_v57 = vsel %vm201_vm3, %v200_v56, %v181_v54 }
  0x99   :  { %v185_v58 = vpop.permute.xlu0 %184  ;;  %v189_v60 = vpop.permute.xlu1 %188 }
  0x9a   :  { %v204_v59 = vsel %vm203_vm4, %v202_v57, %v185_v58 }
  0x9b   :  { %v206_v61 = vsel %vm205_vm5, %v204_v59, %v189_v60 }
  0x9d   :  { %v193_v62 = vpop.permute.xlu0 %192 }
  0x9e   :  { %v208_v63 = vsel %vm207_vm6, %v206_v61, %v193_v62 }
  0x9f   :  { %210 = vst.msk [vmem:[#allocation5] sm:$0xff] %vm209_vm7, %v208_v63 }
  0xa0   :  { %282 = shalt.err (!%p279_p9)
}
  0xa1   :  { %220 = dma.vmem_to_hbm [thread:$0]  %s218_s20, 128, %s327_s1, [#allocation4]  }
  0xa2   :  { %293 = dma.done.wait [#allocation4], 128  }
  0xa3   :  { %294 = vsyncadd [#allocation4], 4294967168 }
  0xa4   :  { %224 = vsyncpa [#allocation3], 1 }
  0xa5   :  { %225 = vsyncpa [#allocation4], 1 }

// kernel: tpu_custom_call.1
= control target key start
LH: loop header
LB: loop body
LE: loop exit
PB: predicated region body
PF: predicated region fallthrough
CT: control target
= control target key end

     0   :  { %6 = vsyncpa [#allocation3], 0  ;;  %s140_s0 = inlined_call_operand.hbm [shape: f32[8,16,16], index: 0, kind: input, shape index: {}]   ;;  %s141_s1 = inlined_call_operand.hbm [shape: f32[8,8,8], index: 1, kind: output, shape index: {}]  }
   0x1   :  { %7 = vsyncpa [#allocation4], 0  ;;  %s106_s6 = smov [#allocation2]  }
   0x2   :  { %s13_s7 = sshll.u32 %s106_s6, 4  ;;  %s14_s7 = int_to_ptr.vmem [resolvable:$true] %s13_s7 }
   0x3   :  { %s70_s8 = scalar_lea.vmem %s14_s7, 1024  ;;  %p75_p1 = scmp.lt.s32.totalorder %s14_s7, %s14_s7 }
   0x4   :  { %p71_p0 = scmp.ne.s32.totalorder %s14_s7, %s70_s8  ;;  %p76_p2 = scmp.lt.s32.totalorder %s70_s8, %s70_s8 }
   0x6   :  { %p77_p3 = por %p76_p2, %p75_p1 }
   0x8   :  { %p78_p4 = pnand %p77_p3, %p71_p0 }
   0xa   :  { %81 = shalt.err (!%p78_p4)
}
   0xb   :  { %s107_s9 = smov 256   ;;  %s108_s10 = smov 128  }
   0xc   :  { %s109_s11 = smov 8  }
   0xd   :  { %19 = dma.hbm_to_vmem [thread:$0]  %s140_s0, 1024, %s14_s7, [#allocation3], %s107_s9, %s108_s10, %s109_s11  }
   0xe   :  { %102 = dma.done.wait [#allocation3], 1024  }
   0xf   :  { %103 = vsyncadd [#allocation3], 4294966272  ;;  %vm31_vm0 = vcmask 64512   ;;  %s110_s14 = smov [#allocation5]   ;;  %v23_v0 = vld [vmem:[#allocation2] sm:$0xff]  ;;  %v24_v1 = vld [vmem:[#allocation2 + $0x8] sm:$0xff] }
  0x10   :  { %s45_s15 = sshll.u32 %s110_s14, 4  ;;  %v25_v2 = vld [vmem:[#allocation2 + $0x10] sm:$0xff]  ;;  %32 = vst.msk [vmem:[#allocation5] sm:$0xff] %vm31_vm0, %v23_v0  ;;  %33 = vst.msk [vmem:[#allocation5 + $0x8] sm:$0xff] %vm31_vm0, %v24_v1  ;;  %v26_v3 = vld [vmem:[#allocation2 + $0x18] sm:$0xff]  ;;  %s46_s15 = int_to_ptr.vmem [resolvable:$true] %s45_s15 }
  0x11   :  { %34 = vst.msk [vmem:[#allocation5 + $0x10] sm:$0xff] %vm31_vm0, %v25_v2  ;;  %v27_v4 = vld [vmem:[#allocation2 + $0x20] sm:$0xff]  ;;  %v28_v5 = vld [vmem:[#allocation2 + $0x28] sm:$0xff]  ;;  %35 = vst.msk [vmem:[#allocation5 + $0x18] sm:$0xff] %vm31_vm0, %v26_v3  ;;  %s82_s0 = scalar_lea.vmem %s46_s15, 1024  ;;  %p87_p6 = scmp.lt.s32.totalorder %s46_s15, %s46_s15 }
  0x12   :  { %36 = vst.msk [vmem:[#allocation5 + $0x20] sm:$0xff] %vm31_vm0, %v27_v4  ;;  %37 = vst.msk [vmem:[#allocation5 + $0x28] sm:$0xff] %vm31_vm0, %v28_v5  ;;  %v29_v6 = vld [vmem:[#allocation2 + $0x30] sm:$0xff]  ;;  %v30_v7 = vld [vmem:[#allocation2 + $0x38] sm:$0xff]  ;;  %p83_p5 = scmp.ne.s32.totalorder %s46_s15, %s82_s0  ;;  %p88_p7 = scmp.lt.s32.totalorder %s82_s0, %s82_s0 }
  0x13   :  { %38 = vst.msk [vmem:[#allocation5 + $0x30] sm:$0xff] %vm31_vm0, %v29_v6  ;;  %39 = vst.msk [vmem:[#allocation5 + $0x38] sm:$0xff] %vm31_vm0, %v30_v7 }
  0x14   :  { %p89_p8 = por %p88_p7, %p87_p6 }
  0x16   :  { %p90_p9 = pnand %p89_p8, %p83_p5 }
  0x18   :  { %93 = shalt.err (!%p90_p9)
}
  0x19   :  { %51 = dma.vmem_to_hbm [thread:$0]  %s46_s15, 1024, %s141_s1, [#allocation4], %s108_s10, %s108_s10, %s109_s11  }
  0x1a   :  { %104 = dma.done.wait [#allocation4], 1024  }
  0x1b   :  { %105 = vsyncadd [#allocation4], 4294966272 }
  0x1c   :  { %55 = vsyncpa [#allocation3], 1 }
  0x1d   :  { %56 = vsyncpa [#allocation4], 1 }

</bundles_post_ra>
